<compile_context>
chip_gen: v6e
topology: v6e:2x2x1
jax: 0.10.0
libtpu: 0.0.40
codegen_flags: <defaults>
</compile_context>

<pallas_src>
import jax
import jax.numpy as jnp
from jax.experimental import pallas as pl
from jax.experimental.pallas import tpu as pltpu  # noqa: F401  (TPU backend assumed)

# ---- config (Config() is not defined in the source; pick small values) ----
DIM = 10
NUM_HEADS = 2
HIDDEN_DIM = 8
P_DROP = 0.3


def _attn_dropout_kernel(x1_ref, x2_ref, x3_ref, keep_ref, o_ref):
    """Single invocation: all batch elements resident in VMEM.

    x1_ref  : (B, S1, D)   queries
    x2_ref  : (B, S2, D)   keys
    x3_ref  : (B, S2, Dv)  values (the undefined `x3` of the torch module)
    keep_ref: (B, S1, S2)  dropout keep mask (0./1., f32)
    o_ref   : (B, S1, Dv)
    """
    q = x1_ref[...]
    k = x2_ref[...]
    v = x3_ref[...]
    keep = keep_ref[...]

    # qk = x1 @ x2^T (batched), scaled by 1/10
    qk = jnp.einsum("bqd,bkd->bqk", q, k,
                    preferred_element_type=jnp.float32) * jnp.float32(0.1)

    # softmax over last dim
    m = jnp.max(qk, axis=-1, keepdims=True)
    e = jnp.exp(qk - m)
    p = e / jnp.sum(e, axis=-1, keepdims=True)

    # dropout(p=0.3, training=True): Bernoulli keep mask, scale by 1/(1-p)
    dropped = p * keep * jnp.float32(1.0 / (1.0 - P_DROP))

    # output = dropout_qk @ x3 (batched)
    out = jnp.einsum("bqk,bkd->bqd", dropped, v,
                     preferred_element_type=jnp.float32)
    o_ref[...] = out.astype(o_ref.dtype)


def model_forward(x1, x2, x3, dropout_key):
    B, S1, D = x1.shape
    _, S2, _ = x2.shape
    Dv = x3.shape[-1]

    # Bernoulli keep mask (p_keep = 1 - P_DROP), generated once for all batches.
    keep = jax.random.bernoulli(
        dropout_key, 1.0 - P_DROP, (B, S1, S2)).astype(jnp.float32)

    # No grid: whole arrays are single full-size blocks in VMEM (one kernel step).
    out = pl.pallas_call(
        _attn_dropout_kernel,
        out_shape=jax.ShapeDtypeStruct((B, S1, Dv), x1.dtype),
        in_specs=[
            pl.BlockSpec((B, S1, D), lambda: (0, 0, 0)),
            pl.BlockSpec((B, S2, D), lambda: (0, 0, 0)),
            pl.BlockSpec((B, S2, Dv), lambda: (0, 0, 0)),
            pl.BlockSpec((B, S1, S2), lambda: (0, 0, 0)),
        ],
        out_specs=pl.BlockSpec((B, S1, Dv), lambda: (0, 0, 0)),
    )(x1, x2, x3, keep)
    return out, keep


def _reference(x1, x2, x3, keep):
    qk = jnp.einsum("bqd,bkd->bqk", x1, x2) / 10.0
    p = jax.nn.softmax(qk, axis=-1)
    dropped = p * keep / (1.0 - P_DROP)
    return jnp.einsum("bqk,bkd->bqd", dropped, x3)


def init_unused_params(key):
    """Deterministic init of the module's (unused-in-forward) Linear layers."""
    ks = jax.random.split(key, 4)
    hd = NUM_HEADS * HIDDEN_DIM
    return {
        "qk_lin_w": jax.random.normal(ks[0], (hd, DIM), jnp.float32) * 0.02,
        "qk_lin_b": jnp.zeros((hd,), jnp.float32),
        "v_lin_w": jax.random.normal(ks[1], (hd, DIM), jnp.float32) * 0.02,
        "v_lin_b": jnp.zeros((hd,), jnp.float32),
        "dropout_lin_w": jax.random.normal(ks[2], (hd, hd), jnp.float32) * 0.02,
        "dropout_lin_b": jnp.zeros((hd,), jnp.float32),
        "output_lin_w": jax.random.normal(ks[3], (DIM, hd), jnp.float32) * 0.02,
        "output_lin_b": jnp.zeros((DIM,), jnp.float32),
    }


if __name__ == "__main__":
    key = jax.random.PRNGKey(0)
    k1, k2, k3, kp, kd = jax.random.split(key, 5)

    B, S1, S2, D = 5, 4, 2, DIM
    x1 = jax.random.normal(k1, (B, S1, D), dtype=jnp.float32)   # torch.randn(5, 4, 10)
    x2 = jax.random.normal(k2, (B, S2, D), dtype=jnp.float32)   # torch.randn(5, 2, 10)
    x3 = jax.random.normal(k3, (B, S2, D), dtype=jnp.float32)   # undefined global `x3`

    _ = init_unused_params(kp)  # created for fidelity; forward() never touches them

    out, keep = model_forward(x1, x2, x3, dropout_key=kd)
    out = jax.block_until_ready(out)
    assert out.shape == (B, S1, D)

    ref = _reference(x1, x2, x3, keep)
    assert jnp.allclose(out, ref, atol=1e-3, rtol=1e-3)

    print("KERNEL_OK")
</pallas_src>

<mosaic_0001>
module attributes {stable_mosaic.version = 11 : i64} {
  func.func @_attn_dropout_kernel(%arg0: memref<5x4x10xf32, #tpu.memory_space<vmem>>, %arg1: memref<5x2x10xf32, #tpu.memory_space<vmem>>, %arg2: memref<5x2x10xf32, #tpu.memory_space<vmem>>, %arg3: memref<5x4x2xf32, #tpu.memory_space<vmem>>, %arg4: memref<5x4x10xf32, #tpu.memory_space<vmem>>) attributes {dimension_semantics = [], scalar_prefetch = 0 : i64, scratch_operands = 0 : i64, tpu.core_type = #tpu.core_type<tc>} {
    %c0 = arith.constant 0 : index
    %c0_0 = arith.constant 0 : index
    %c0_1 = arith.constant 0 : index
    %0 = vector.load %arg0[%c0, %c0_0, %c0_1] : memref<5x4x10xf32, #tpu.memory_space<vmem>>, vector<5x4x10xf32>
    %c0_2 = arith.constant 0 : index
    %c0_3 = arith.constant 0 : index
    %c0_4 = arith.constant 0 : index
    %1 = vector.load %arg1[%c0_2, %c0_3, %c0_4] : memref<5x2x10xf32, #tpu.memory_space<vmem>>, vector<5x2x10xf32>
    %c0_5 = arith.constant 0 : index
    %c0_6 = arith.constant 0 : index
    %c0_7 = arith.constant 0 : index
    %2 = vector.load %arg2[%c0_5, %c0_6, %c0_7] : memref<5x2x10xf32, #tpu.memory_space<vmem>>, vector<5x2x10xf32>
    %c0_8 = arith.constant 0 : index
    %c0_9 = arith.constant 0 : index
    %c0_10 = arith.constant 0 : index
    %3 = vector.load %arg3[%c0_8, %c0_9, %c0_10] : memref<5x4x2xf32, #tpu.memory_space<vmem>>, vector<5x4x2xf32>
    "tpu.trace_start"() <{level = 10 : i32, message = "bqd,bkd->bqk"}> : () -> ()
    %cst = arith.constant dense<0.000000e+00> : vector<5x4x2xf32>
    %4 = tpu.matmul %0, %1, %cst {dimension_numbers = #tpu.dot_dimension_numbers<[2], [2], [1], [1], [0, 0, 0, 1, 1, 1], [0], [0]>} : vector<5x4x10xf32>, vector<5x2x10xf32>, vector<5x4x2xf32> -> vector<5x4x2xf32>
    "tpu.trace_stop"() : () -> ()
    %cst_11 = arith.constant 1.000000e-01 : f32
    %5 = vector.broadcast %cst_11 : f32 to vector<5x4x2xf32>
    %6 = arith.mulf %4, %5 : vector<5x4x2xf32>
    %cst_12 = arith.constant dense<0xFF800000> : vector<5x4xf32>
    %7 = vector.multi_reduction <maximumf>, %6, %cst_12 [2] : vector<5x4x2xf32> to vector<5x4xf32>
    %8 = vector.shape_cast %7 : vector<5x4xf32> to vector<5x4x1xf32>
    %9 = vector.broadcast %8 : vector<5x4x1xf32> to vector<5x4x2xf32>
    %10 = arith.subf %6, %9 : vector<5x4x2xf32>
    %11 = math.exp %10 : vector<5x4x2xf32>
    %cst_13 = arith.constant dense<0.000000e+00> : vector<5x4xf32>
    %12 = vector.multi_reduction <add>, %11, %cst_13 [2] : vector<5x4x2xf32> to vector<5x4xf32>
    %13 = vector.shape_cast %12 : vector<5x4xf32> to vector<5x4x1xf32>
    %14 = vector.broadcast %13 : vector<5x4x1xf32> to vector<5x4x2xf32>
    %15 = arith.divf %11, %14 : vector<5x4x2xf32>
    %16 = arith.mulf %15, %3 : vector<5x4x2xf32>
    %cst_14 = arith.constant 1.42857146 : f32
    %17 = vector.broadcast %cst_14 : f32 to vector<5x4x2xf32>
    %18 = arith.mulf %16, %17 : vector<5x4x2xf32>
    "tpu.trace_start"() <{level = 10 : i32, message = "bqk,bkd->bqd"}> : () -> ()
    %cst_15 = arith.constant dense<0.000000e+00> : vector<5x4x10xf32>
    %19 = tpu.matmul %18, %2, %cst_15 {dimension_numbers = #tpu.dot_dimension_numbers<[2], [1], [1], [2], [0, 0, 0, 1, 1, 2], [0], [0]>} : vector<5x4x2xf32>, vector<5x2x10xf32>, vector<5x4x10xf32> -> vector<5x4x10xf32>
    "tpu.trace_stop"() : () -> ()
    %c0_16 = arith.constant 0 : index
    %c0_17 = arith.constant 0 : index
    %c0_18 = arith.constant 0 : index
    %20 = vector.load %arg4[%c0_16, %c0_17, %c0_18] : memref<5x4x10xf32, #tpu.memory_space<vmem>>, vector<5x4x10xf32>
    tpu.vector_store %arg4[%c0_16, %c0_17, %c0_18], %19 {strides = array<i32>} : memref<5x4x10xf32, #tpu.memory_space<vmem>>, vector<5x4x10xf32>,
    return
  }
}

</mosaic_0001>

<bundles_post_ra>
// kernel: tpu_custom_call.1
= control target key start
LH: loop header
LB: loop body
LE: loop exit
PB: predicated region body
PF: predicated region fallthrough
CT: control target
= control target key end

     0   :  { %9 = vsyncpa [#allocation3], 0  ;;  %s1220_s0 = inlined_call_operand.vmem [shape: f32[5,4,10], index: 0, kind: input, shape index: {}]   ;;  %s1221_s1 = inlined_call_operand.hbm [shape: f32[5,2,10], index: 1, kind: input, shape index: {}]   ;;  %s1222_s2 = inlined_call_operand.vmem [shape: f32[5,2,10], index: 2, kind: input, shape index: {}]   ;;  %s1223_s3 = inlined_call_operand.vmem [shape: f32[5,4,2], index: 3, kind: input, shape index: {}]   ;;  %s1224_s4 = inlined_call_operand.hbm [shape: f32[5,4,10], index: 4, kind: output, shape index: {}]  }
   0x1   :  { %10 = vsyncpa [#allocation4], 0  ;;  %s1071_s15 = smov [#allocation2]  }
   0x2   :  { %s18_s16 = sshll.u32 %s1071_s15, 4  ;;  %s19_s16 = int_to_ptr.vmem [resolvable:$true] %s18_s16 }
   0x3   :  { %s1035_s17 = scalar_lea.vmem %s19_s16, 160  ;;  %p1040_p1 = scmp.lt.s32.totalorder %s19_s16, %s19_s16 }
   0x4   :  { %p1036_p0 = scmp.ne.s32.totalorder %s19_s16, %s1035_s17  ;;  %p1041_p2 = scmp.lt.s32.totalorder %s1035_s17, %s1035_s17 }
   0x6   :  { %p1042_p3 = por %p1041_p2, %p1040_p1 }
   0x8   :  { %p1043_p4 = pnand %p1042_p3, %p1036_p0 }
   0xa   :  { %1046 = shalt.err (!%p1043_p4)
}
   0xb   :  { %s1072_s18 = smov 32   ;;  %s1073_s19 = smov 2  }
   0xc   :  { %24 = dma.hbm_to_vmem [thread:$0]  %s1221_s1, 160, %s19_s16, [#allocation3], %s1072_s18, %s1072_s18, %s1073_s19  }
   0xd   :  { %1067 = dma.done.wait [#allocation3], 160  }
   0xe   :  { %1068 = vsyncadd [#allocation3], 4294967136  ;;  %v1074_v0 = vmov 0.0   ;;  %vm1075_vm0 = vmmov 0   ;;  %vm52_vm1 = vcmask 80896   ;;  %vm438_vm2 = vcmask 11264  }
   0xf   :  { %949 = vmatprep.subr.mxu0 %v1074_v0  ;;  %951 = vmatprep.mubr.msk.f32.mxu0 %vm1075_vm0, %v1074_v0  ;;  %v37_v1 = vld [vmem:[#allocation2] sm:$0x3]  ;;  %v38_v2 = vld [vmem:[#allocation2 + $0x2] sm:$0x3]  ;;  %v33_v4 = vld [vmem:[%s1220_s0 + $0x4] sm:$0xf] }
  0x10   :  { %954 = vmatprep.subr.mxu1 %v1074_v0  ;;  %956 = vmatprep.mubr.msk.f32.mxu1 %vm1075_vm0, %v1074_v0  ;;  %v32_v3 = vld [vmem:[%s1220_s0] sm:$0xf]  ;;  %v39_v5 = vld [vmem:[#allocation2 + $0x4] sm:$0x3]  ;;  %v40_v6 = vld [vmem:[#allocation2 + $0x6] sm:$0x3] }
  0x11   :  { %950 = vmatpush3.xpose.msk.msra.mxu0 %vm52_vm1, %v37_v1  ;;  %955 = vmatpush3.xpose.msk.msra.mxu1 %vm52_vm1, %v38_v2  ;;  %v34_v7 = vld [vmem:[%s1220_s0 + $0x8] sm:$0xf]  ;;  %v35_v9 = vld [vmem:[%s1220_s0 + $0xc] sm:$0xf]  ;;  %v36_v10 = vld [vmem:[%s1220_s0 + $0x10] sm:$0xf] }
  0x12   :  { %959 = vmatprep.subr.mxu0 %v1074_v0  ;;  %964 = vmatprep.subr.mxu1 %v1074_v0  ;;  %v41_v8 = vld [vmem:[#allocation2 + $0x8] sm:$0x3]  ;;  %v42_v56 = vld [vmem:[%s1222_s2] sm:$0x3]  ;;  %vm508_vm3 = vcmask 1041408   ;;  %vm504_vm4 = vcmask 15360  }
  0x13   :  { %v43_v57 = vld [vmem:[%s1222_s2 + $0x2] sm:$0x3]  ;;  %vm886_vm5 = vcmask 76800  }
  0x14   :  { %952 = vmatmul.mubr.msk.f32.vlgmr.msra.gmra.mxu0 %vm52_vm1, %v32_v3  ;;  %957 = vmatmul.mubr.msk.f32.vlgmr.msra.gmra.mxu1 %vm52_vm1, %v33_v4  ;;  %v47_v1 = vld [vmem:[%s1223_s3] sm:$0xf] }
  0x15   :  { %960 = vmatpush3.xpose.msk.msra.mxu0 %vm52_vm1, %v39_v5  ;;  %961 = vmatprep.mubr.msk.f32.mxu0 %vm1075_vm0, %v1074_v0  ;;  %v48_v5 = vld [vmem:[%s1223_s3 + $0x4] sm:$0xf] }
  0x16   :  { %965 = vmatpush3.xpose.msk.msra.mxu1 %vm52_vm1, %v40_v6  ;;  %969 = vmatprep.subr.mxu0 %v1074_v0 }
  0x17   :  { %966 = vmatprep.mubr.msk.f32.mxu1 %vm1075_vm0, %v1074_v0  ;;  %974 = vmatprep.subr.mxu1 %v1074_v0 }
  0x18   :  { %962 = vmatmul.mubr.msk.f32.vlgmr.msra.gmra.mxu0 %vm52_vm1, %v34_v7 }
  0x19   :  { %970 = vmatpush3.xpose.msk.msra.mxu0 %vm52_vm1, %v41_v8  ;;  %967 = vmatmul.mubr.msk.f32.vlgmr.msra.gmra.mxu1 %vm52_vm1, %v35_v9  ;;  %v44_v8 = vld [vmem:[%s1222_s2 + $0x4] sm:$0x3] }
  0x1a   :  { %971 = vmatprep.mubr.msk.f32.mxu0 %vm1075_vm0, %v1074_v0  ;;  %976 = vmatprep.mubr.msk.f32.mxu1 %vm1075_vm0, %v1074_v0 }
  0x1b   :  { %979 = vmatprep.subr.mxu0 %v1074_v0  ;;  %975 = vmatpush3.msk.msra.mxu1 %vm508_vm3, %v42_v56 }
  0x1c   :  { %972 = vmatmul.mubr.msk.f32.vlgmr.msra.gmra.mxu0 %vm52_vm1, %v36_v10  ;;  %984 = vmatprep.subr.mxu1 %v1074_v0  ;;  %v49_v10 = vld [vmem:[%s1223_s3 + $0x8] sm:$0xf] }
  0x1d   :  { %981 = vmatprep.mubr.msk.f32.mxu0 %vm1075_vm0, %v1074_v0  ;;  %980 = vmatpush3.msk.msra.mxu0 %vm508_vm3, %v43_v57 }
  0x1e   :  { %989 = vmatprep.subr.mxu0 %v1074_v0 }
  0xd4   :  { %v125_v11 = vpop.f32.mrf.mxu0  ;;  %v201_v12 = vpop.f32.mrf.mxu1 }
  0xd5   :  { %v433_v13 = vmul.f32 0.1, %v125_v11  ;;  %v434_v14 = vmul.f32 0.1, %v201_v12 }
  0xd6   :  { %v953_v15 = vpop.f32.mrf.mxu0  ;;  %v958_v16 = vpop.f32.mrf.mxu1 }
  0xd7   :  { %v439_v17 = vsel %vm438_vm2, %v433_v13, -inf  ;;  %v442_v21 = vsel %vm438_vm2, %v434_v14, -inf  ;;  %v50_v15 = vld [vmem:[%s1223_s3 + $0xc] sm:$0xf] }
  0xd8   :  { %440 = vmax.xlane.f32.xlu0 %v439_v17  ;;  %v277_v18 = vpop.f32.mrf.mxu0 }
  0xd9   :  { %v435_v19 = vmul.f32 0.1, %v277_v18  ;;  %v353_v20 = vpop.f32.mrf.mxu1 }
  0xda   :  { %v963_v22 = vpop.f32.mrf.mxu0  ;;  %v436_v23 = vmul.f32 0.1, %v353_v20  ;;  %v51_v20 = vld [vmem:[%s1223_s3 + $0x10] sm:$0xf] }
  0xdb   :  { %v445_v24 = vsel %vm438_vm2, %v435_v19, -inf  ;;  %v968_v25 = vpop.f32.mrf.mxu1 }
  0xdc   :  { %443 = vmax.xlane.f32.xlu0 %v442_v21  ;;  %446 = vmax.xlane.f32.xlu1 %v445_v24  ;;  %v429_v26 = vpop.f32.mrf.mxu0  ;;  %v448_v28 = vsel %vm438_vm2, %v436_v23, -inf }
  0xdd   :  { %v437_v27 = vmul.f32 0.1, %v429_v26 }
  0xde   :  { %v973_v29 = vpop.f32.mrf.mxu0 }
  0xdf   :  { %v451_v30 = vsel %vm438_vm2, %v437_v27, -inf }
  0xe0   :  { %449 = vmax.xlane.f32.xlu1 %v448_v28  ;;  %452 = vmax.xlane.f32.xlu0 %v451_v30 }
 0x161   :  { %v441_v31 = vpop.xlane.xlu0 %440 }
 0x162   :  { %v454_v32 = vsub.f32 %v433_v13, %v441_v31 }
 0x164   :  { %v459_v33 = vmul.f32 1.442695, %v454_v32 }
 0x165   :  { %v444_v34 = vpop.xlane.xlu0 %443  ;;  %v447_v35 = vpop.xlane.xlu1 %446 }
 0x166   :  { %1007 = vpow2.f32 %v459_v33  ;;  %v455_v36 = vsub.f32 %v434_v14, %v444_v34  ;;  %v456_v37 = vsub.f32 %v435_v19, %v447_v35  ;;  %v45_v19 = vld [vmem:[%s1222_s2 + $0x6] sm:$0x3] }
 0x168   :  { %v461_v38 = vmul.f32 1.442695, %v455_v36  ;;  %v463_v39 = vmul.f32 1.442695, %v456_v37 }
 0x169   :  { %v450_v40 = vpop.xlane.xlu1 %449  ;;  %v453_v41 = vpop.xlane.xlu0 %452 }
 0x16a   :  { %1009 = vpow2.f32 %v461_v38  ;;  %v457_v42 = vsub.f32 %v436_v23, %v450_v40  ;;  %v458_v43 = vsub.f32 %v437_v27, %v453_v41  ;;  %v46_v23 = vld [vmem:[%s1222_s2 + $0x8] sm:$0x3]  ;;  %s1076_s2 = smov [#allocation5]  }
 0x16b   :  { %1011 = vpow2.f32 %v463_v39  ;;  %s897_s3 = sshll.u32 %s1076_s2, 4  ;;  %s898_s3 = int_to_ptr.vmem [resolvable:$true] %s897_s3 }
 0x16c   :  { %v465_v44 = vmul.f32 1.442695, %v457_v42  ;;  %v467_v45 = vmul.f32 1.442695, %v458_v43  ;;  %s1047_s23 = scalar_lea.vmem %s898_s3, 320  ;;  %p1052_p6 = scmp.lt.s32.totalorder %s898_s3, %s898_s3 }
 0x16d   :  { %p1048_p5 = scmp.ne.s32.totalorder %s898_s3, %s1047_s23  ;;  %p1053_p7 = scmp.lt.s32.totalorder %s1047_s23, %s1047_s23 }
 0x16e   :  { %1013 = vpow2.f32 %v465_v44 }
 0x16f   :  { %1015 = vpow2.f32 %v467_v45  ;;  %p1054_p8 = por %p1053_p7, %p1052_p6 }
 0x171   :  { %p1055_p9 = pnand %p1054_p8, %p1048_p5 }
 0x173   :  { %v1008_v46 = vpop.eup %1007 }
 0x174   :  { %v469_v47 = vsel %vm438_vm2, %v1008_v46, 0.0 }
 0x175   :  { %470 = vadd.xlane.f32.xlu1 %v469_v47 }
 0x177   :  { %v1010_v48 = vpop.eup %1009 }
 0x178   :  { %v1012_v49 = vpop.eup %1011  ;;  %v472_v50 = vsel %vm438_vm2, %v1010_v48, 0.0 }
 0x179   :  { %v475_v51 = vsel %vm438_vm2, %v1012_v49, 0.0  ;;  %473 = vadd.xlane.f32.xlu0 %v472_v50 }
 0x17a   :  { %476 = vadd.xlane.f32.xlu1 %v475_v51 }
 0x17b   :  { %v1014_v52 = vpop.eup %1013 }
 0x17c   :  { %v1016_v53 = vpop.eup %1015  ;;  %v478_v54 = vsel %vm438_vm2, %v1014_v52, 0.0 }
 0x17d   :  { %479 = vadd.xlane.f32.xlu0 %v478_v54  ;;  %v481_v55 = vsel %vm438_vm2, %v1016_v53, 0.0 }
 0x17e   :  { %482 = vadd.xlane.f32.xlu1 %v481_v55 }
 0x1fe   :  { %v471_v58 = vpop.xlane.xlu1 %470 }
 0x1ff   :  { %1017 = vrcp.f32 %v471_v58 }
 0x202   :  { %v474_v59 = vpop.xlane.xlu0 %473 }
 0x203   :  { %v477_v60 = vpop.xlane.xlu1 %476  ;;  %1019 = vrcp.f32 %v474_v59 }
 0x204   :  { %1021 = vrcp.f32 %v477_v60 }
 0x206   :  { %v480_v61 = vpop.xlane.xlu0 %479 }
 0x207   :  { %v483_v62 = vpop.xlane.xlu1 %482  ;;  %1023 = vrcp.f32 %v480_v61 }
 0x208   :  { %1025 = vrcp.f32 %v483_v62 }
 0x20c   :  { %v1018_v63 = vpop.eup %1017 }
 0x20d   :  { %v485_v2 = vmul.f32 %v1018_v63, %v1008_v46 }
 0x20f   :  { %v494_v3 = vmul.f32 %v485_v2, %v47_v1 }
 0x210   :  { %v1020_v4 = vpop.eup %1019 }
 0x211   :  { %v1022_v6 = vpop.eup %1021  ;;  %v499_v7 = vmul.f32 1.4285715, %v494_v3  ;;  %v487_v9 = vmul.f32 %v1020_v4, %v1010_v48 }
 0x212   :  { %v489_v11 = vmul.f32 %v1022_v6, %v1012_v49 }
 0x213   :  { %977 = vmatmul.mubr.msk.f32.vlgmr.msra.gmra.mxu1 %vm504_vm4, %v499_v7  ;;  %v495_v12 = vmul.f32 %v487_v9, %v48_v5 }
 0x214   :  { %v1024_v13 = vpop.eup %1023  ;;  %985 = vmatpush3.msk.msra.mxu1 %vm508_vm3, %v44_v8  ;;  %986 = vmatprep.mubr.msk.f32.mxu1 %vm1075_vm0, %v1074_v0  ;;  %v496_v14 = vmul.f32 %v489_v11, %v49_v10 }
 0x215   :  { %v1026_v16 = vpop.eup %1025  ;;  %v491_v17 = vmul.f32 %v1024_v13, %v1014_v52  ;;  %v500_v18 = vmul.f32 1.4285715, %v495_v12  ;;  %994 = vmatprep.subr.mxu1 %v1074_v0 }
 0x216   :  { %v493_v21 = vmul.f32 %v1026_v16, %v1016_v53  ;;  %v501_v22 = vmul.f32 1.4285715, %v496_v14 }
 0x217   :  { %982 = vmatmul.mubr.msk.f32.vlgmr.msra.gmra.mxu0 %vm504_vm4, %v500_v18  ;;  %v497_v24 = vmul.f32 %v491_v17, %v50_v15 }
 0x218   :  { %987 = vmatmul.mubr.msk.f32.vlgmr.msra.gmra.mxu1 %vm504_vm4, %v501_v22  ;;  %990 = vmatpush3.msk.msra.mxu0 %vm508_vm3, %v45_v19  ;;  %v498_v25 = vmul.f32 %v493_v21, %v51_v20 }
 0x219   :  { %995 = vmatpush3.msk.msra.mxu1 %vm508_vm3, %v46_v23  ;;  %991 = vmatprep.mubr.msk.f32.mxu0 %vm1075_vm0, %v1074_v0  ;;  %v502_v26 = vmul.f32 1.4285715, %v497_v24 }
 0x21a   :  { %996 = vmatprep.mubr.msk.f32.mxu1 %vm1075_vm0, %v1074_v0  ;;  %v503_v27 = vmul.f32 1.4285715, %v498_v25 }
 0x21b   :  { %992 = vmatmul.mubr.msk.f32.vlgmr.msra.gmra.mxu0 %vm504_vm4, %v502_v26 }
 0x21c   :  { %997 = vmatmul.mubr.msk.f32.vlgmr.msra.gmra.mxu1 %vm504_vm4, %v503_v27 }
 0x2d3   :  { %v578_v28 = vpop.f32.mrf.mxu1 }
 0x2d4   :  { %887 = vst.msk [vmem:[#allocation5] sm:$0xf] %vm886_vm5, %v578_v28 }
 0x2d5   :  { %v978_v29 = vpop.f32.mrf.mxu1 }
 0x2d7   :  { %v654_v30 = vpop.f32.mrf.mxu0 }
 0x2d8   :  { %888 = vst.msk [vmem:[#allocation5 + $0x4] sm:$0xf] %vm886_vm5, %v654_v30  ;;  %v730_v31 = vpop.f32.mrf.mxu1 }
 0x2d9   :  { %889 = vst.msk [vmem:[#allocation5 + $0x8] sm:$0xf] %vm886_vm5, %v730_v31  ;;  %v983_v32 = vpop.f32.mrf.mxu0 }
 0x2da   :  { %v988_v0 = vpop.f32.mrf.mxu1 }
 0x2db   :  { %v806_v33 = vpop.f32.mrf.mxu0 }
 0x2dc   :  { %890 = vst.msk [vmem:[#allocation5 + $0xc] sm:$0xf] %vm886_vm5, %v806_v33  ;;  %v882_v34 = vpop.f32.mrf.mxu1 }
 0x2dd   :  { %891 = vst.msk [vmem:[#allocation5 + $0x10] sm:$0xf] %vm886_vm5, %v882_v34  ;;  %v993_v35 = vpop.f32.mrf.mxu0 }
 0x2de   :  { %v998_v36 = vpop.f32.mrf.mxu1 }
 0x2df   :  { %1058 = shalt.err (!%p1055_p9)
}
 0x2e0   :  { %s1077_s24 = smov 64   ;;  %s1078_s25 = smov 4  }
 0x2e1   :  { %903 = dma.vmem_to_hbm [thread:$0]  %s898_s3, 320, %s1224_s4, [#allocation4], %s1077_s24, %s1077_s24, %s1078_s25  }
 0x2e2   :  { %1069 = dma.done.wait [#allocation4], 320  }
 0x2e3   :  { %1070 = vsyncadd [#allocation4], 4294966976 }
 0x2e4   :  { %907 = vsyncpa [#allocation3], 1 }
 0x2e5   :  { %908 = vsyncpa [#allocation4], 1 }

</bundles_post_ra>
